<compile_context>
chip_gen: v5e
topology: v5e:2x2
jax: 0.10.0
libtpu: 0.0.40
codegen_flags: <defaults>
</compile_context>

<pallas_src>
import jax
import jax.numpy as jnp
from jax.experimental import pallas as pl
from jax.experimental.pallas import tpu as pltpu


def _linear_kernel(x_ref, w_ref, b_ref, o_ref):
    # x_ref : (TB, E_in)        VMEM  (one batch tile)
    # w_ref : (E_in, E_out_p)   VMEM  (pre-transposed, grid-resident)
    # b_ref : (1, E_out_p)      VMEM  (grid-resident)
    # o_ref : (TB, E_out_p)     VMEM
    acc = jnp.dot(x_ref[...], w_ref[...], preferred_element_type=jnp.float32)
    o_ref[...] = (acc + b_ref[...]).astype(o_ref.dtype)


def _round_up(x, m):
    return ((x + m - 1) // m) * m


def keypoint_encoder_forward(keypoints, weight, bias, *, max_batch_tile=2048):
    """keypoints: (B, E_in); weight: (E_out, E_in); bias: (E_out,)."""
    B, E_in = keypoints.shape
    E_out = weight.shape[0]

    # Lane-dense output width (multiple of 128 lanes) -> unmasked full-lane vst.
    E_out_p = _round_up(E_out, 128)

    # Pad the batch only to the sublane multiple of 8 (worst-case waste <8 rows).
    B8 = _round_up(B, 8)

    # Batch tile: multiple of 8, capped at max_batch_tile. For >=16 rows, also
    # cap at ~half the rows so the grid has >=2 steps (v7x dual-TC utilization).
    if B8 >= 16:
        TB = min(max_batch_tile, _round_up(-(-B8 // 2), 8))
    else:
        TB = B8
    grid = pl.cdiv(B8, TB)  # ragged last block: OOB reads discarded via output slice

    x_p = keypoints if B8 == B else jnp.pad(keypoints, ((0, B8 - B), (0, 0)))

    # One-time transpose of the tiny weight to (E_in, E_out_p); stays
    # VMEM-resident across the whole grid via the constant index_map.
    w_t = weight.T  # (E_in, E_out)
    b_p = bias
    if E_out_p != E_out:
        w_t = jnp.pad(w_t, ((0, 0), (0, E_out_p - E_out)))
        b_p = jnp.pad(b_p, (0, E_out_p - E_out))
    b2 = b_p.reshape(1, E_out_p)

    out = pl.pallas_call(
        _linear_kernel,
        out_shape=jax.ShapeDtypeStruct((B8, E_out_p), keypoints.dtype),
        grid_spec=pltpu.PrefetchScalarGridSpec(
            num_scalar_prefetch=0,
            grid=(grid,),
            in_specs=[
                pl.BlockSpec((TB, E_in), lambda i: (i, 0)),        # batch tile
                pl.BlockSpec((E_in, E_out_p), lambda i: (0, 0)),   # resident W.T
                pl.BlockSpec((1, E_out_p), lambda i: (0, 0)),      # resident bias
            ],
            out_specs=pl.BlockSpec((TB, E_out_p), lambda i: (i, 0)),
        ),
        compiler_params=pltpu.CompilerParams(
            dimension_semantics=("parallel",),
        ),
    )(x_p, w_t, b2)

    # Row slice is cheap; the lane slice (128 -> E_out) is kept for exact
    # module semantics (a fused consumer could take the padded width instead).
    return out[:B, :E_out]


if __name__ == "__main__":
    key = jax.random.PRNGKey(0)
    kx, kw, kb, kx2 = jax.random.split(key, 4)

    # Small shapes consistent with the module: embedding_size_in=32 -> 64.
    E_in, E_out = 32, 64

    # Deterministic parameter init (uniform bound 1/sqrt(fan_in), like
    # PyTorch Linear's default), no checkpoint loading.
    bound = 1.0 / (E_in ** 0.5)
    weight = jax.random.uniform(kw, (E_out, E_in), dtype=jnp.float32,
                                minval=-bound, maxval=bound)
    bias = jax.random.uniform(kb, (E_out,), dtype=jnp.float32,
                              minval=-bound, maxval=bound)

    # (1) Spec-sized batch (single-tile path).
    B = 8
    keypoints = jax.random.normal(kx, (B, E_in), dtype=jnp.float32)
    out = jax.block_until_ready(keypoint_encoder_forward(keypoints, weight, bias))
    ref = keypoints @ weight.T + bias
    assert out.shape == (B, E_out)
    assert jnp.allclose(out, ref, atol=1e-5, rtol=1e-5)

    # (2) Ragged multi-tile batch: exercises grid >= 2, batch padding, and the
    #     partial (masked) last block.
    B2 = 325
    keypoints2 = jax.random.normal(kx2, (B2, E_in), dtype=jnp.float32)
    out2 = jax.block_until_ready(keypoint_encoder_forward(keypoints2, weight, bias))
    ref2 = keypoints2 @ weight.T + bias
    assert out2.shape == (B2, E_out)
    assert jnp.allclose(out2, ref2, atol=1e-5, rtol=1e-5)

    print("KERNEL_OK")
</pallas_src>

<mosaic_0001>
module attributes {stable_mosaic.version = 11 : i64} {
  func.func @_linear_kernel(%arg0: i32, %arg1: memref<8x32xf32, #tpu.memory_space<vmem>>, %arg2: memref<32x128xf32, #tpu.memory_space<vmem>>, %arg3: memref<1x128xf32, #tpu.memory_space<vmem>>, %arg4: memref<8x128xf32, #tpu.memory_space<vmem>>) attributes {dimension_semantics = [#tpu.dimension_semantics<parallel>], iteration_bounds = array<i64: 1>, scalar_prefetch = 0 : i64, scratch_operands = 0 : i64, tpu.core_type = #tpu.core_type<tc>, window_params = [{transform_indices = @transform_0, window_bounds = array<i64: 8, 32>}, {pipeline_mode = #tpu.pipeline_mode<synchronous>, transform_indices = @transform_1, window_bounds = array<i64: 32, 128>}, {pipeline_mode = #tpu.pipeline_mode<synchronous>, transform_indices = @transform_2, window_bounds = array<i64: 1, 128>}, {transform_indices = @transform_3, window_bounds = array<i64: 8, 128>}]} {
    %c0 = arith.constant 0 : index
    %c0_0 = arith.constant 0 : index
    %0 = vector.load %arg1[%c0, %c0_0] : memref<8x32xf32, #tpu.memory_space<vmem>>, vector<8x32xf32>
    %c0_1 = arith.constant 0 : index
    %c0_2 = arith.constant 0 : index
    %1 = vector.load %arg2[%c0_1, %c0_2] : memref<32x128xf32, #tpu.memory_space<vmem>>, vector<32x128xf32>
    %cst = arith.constant dense<0.000000e+00> : vector<8x128xf32>
    %2 = tpu.matmul %0, %1, %cst {dimension_numbers = #tpu.dot_dimension_numbers<[1], [0], [0], [1], [0, 0, 1, 1], [], []>} : vector<8x32xf32>, vector<32x128xf32>, vector<8x128xf32> -> vector<8x128xf32>
    %c0_3 = arith.constant 0 : index
    %c0_4 = arith.constant 0 : index
    %3 = vector.load %arg3[%c0_3, %c0_4] : memref<1x128xf32, #tpu.memory_space<vmem>>, vector<1x128xf32>
    %4 = vector.broadcast %3 : vector<1x128xf32> to vector<8x128xf32>
    %5 = arith.addf %2, %4 : vector<8x128xf32>
    %c0_5 = arith.constant 0 : index
    %c0_6 = arith.constant 0 : index
    %6 = vector.load %arg4[%c0_5, %c0_6] : memref<8x128xf32, #tpu.memory_space<vmem>>, vector<8x128xf32>
    tpu.vector_store %arg4[%c0_5, %c0_6], %5 {strides = array<i32>} : memref<8x128xf32, #tpu.memory_space<vmem>>, vector<8x128xf32>,
    return
  }
  func.func @transform_0(%arg0: i32) -> (i32, i32) {
    %c0_i32 = arith.constant 0 : i32
    %c0_i32_0 = arith.constant 0 : i32
    return %arg0, %c0_i32 : i32, i32
  }
  func.func @transform_1(%arg0: i32) -> (i32, i32) {
    %c0_i32 = arith.constant 0 : i32
    %c0_i32_0 = arith.constant 0 : i32
    %c0_i32_1 = arith.constant 0 : i32
    return %c0_i32, %c0_i32_0 : i32, i32
  }
  func.func @transform_2(%arg0: i32) -> (i32, i32) {
    %c0_i32 = arith.constant 0 : i32
    %c0_i32_0 = arith.constant 0 : i32
    %c0_i32_1 = arith.constant 0 : i32
    return %c0_i32, %c0_i32_0 : i32, i32
  }
  func.func @transform_3(%arg0: i32) -> (i32, i32) {
    %c0_i32 = arith.constant 0 : i32
    %c0_i32_0 = arith.constant 0 : i32
    return %arg0, %c0_i32 : i32, i32
  }
}

</mosaic_0001>

<bundles_post_ra>
// kernel: tpu_custom_call.1
= control target key start
LH: loop header
LB: loop body
LE: loop exit
PB: predicated region body
PF: predicated region fallthrough
CT: control target
= control target key end

     0   :  { %8 = vsyncpa [#allocation3], 0  ;;  %s219_s0 = inlined_call_operand.hbm [shape: f32[8,32], index: 0, kind: input, shape index: {}]   ;;  %s220_s1 = inlined_call_operand.hbm [shape: f32[32,128], index: 1, kind: input, shape index: {}]   ;;  %s221_s2 = inlined_call_operand.vmem [shape: f32[1,128], index: 2, kind: input, shape index: {}]   ;;  %s222_s3 = inlined_call_operand.hbm [shape: f32[8,128], index: 3, kind: output, shape index: {}]  }
   0x1   :  { %9 = vsyncpa [#allocation6], 0 }
   0x2   :  { %10 = vsyncpa [#allocation4], 0  ;;  %s16_s14 = sshll.u32 %s219_s0, 4  ;;  %s182_s15 = smov [#allocation2]   ;;  %s17_s14 = int_to_ptr.hbm [resolvable:$true] %s16_s14 }
   0x3   :  { %s18_s16 = sshll.u32 %s182_s15, 4  ;;  %s26_s19 = sshll.u32 %s220_s1, 4  ;;  %s19_s16 = int_to_ptr.vmem [resolvable:$true] %s18_s16  ;;  %s27_s19 = int_to_ptr.hbm [resolvable:$true] %s26_s19 }
   0x4   :  { %21 = dma.hbm_to_vmem [thread:$0]  %s17_s14, 128, %s19_s16, [#allocation3]  }
   0x5   :  { %s183_s20 = smov [#allocation5]   ;;  %s184_s22 = smov 128  }
   0x6   :  { %s28_s21 = sshll.u32 %s183_s20, 4  ;;  %s185_s23 = smov 8   ;;  %s29_s21 = int_to_ptr.vmem [resolvable:$true] %s28_s21 }
   0x7   :  { %34 = dma.hbm_to_vmem [thread:$0]  %s27_s19, 512, %s29_s21, [#allocation6], %s184_s22, %s184_s22, %s185_s23  }
   0x8   :  { %176 = dma.done.wait [#allocation3], 128  }
   0x9   :  { %177 = vsyncadd [#allocation3], 4294967168 }
   0xa   :  { %178 = dma.done.wait [#allocation6], 512  }
   0xb   :  { %179 = vsyncadd [#allocation6], 4294966784  ;;  %v49_v0 = vld [vmem:[#allocation5 + $0x18] sm:$0xff]  ;;  %v48_v1 = vld [vmem:[#allocation5 + $0x10] sm:$0xff]  ;;  %vm54_vm0 = vcmask 261120   ;;  %s186_s24 = smov [#allocation7]  }
   0xc   :  { %70 = vmatpush.msra.mxu0 %v49_v0  ;;  %v47_v2 = vld [vmem:[#allocation5 + $0x8] sm:$0xff]  ;;  %v46_v3 = vld [vmem:[#allocation5] sm:$0xff]  ;;  %v45_v4 = vld [vmem:[#allocation2] sm:$0xff]  ;;  %s84_s25 = sshll.u32 %s186_s24, 4  ;;  %s86_s28 = sshll.u32 %s222_s3, 4  ;;  %s85_s25 = int_to_ptr.vmem [resolvable:$true] %s84_s25  ;;  %s87_s28 = int_to_ptr.hbm [resolvable:$true] %s86_s28 }
   0xd   :  { %v103_v5 = vld [vmem:[%s221_s2] ss:$0 sm:$0xff] }
   0xe   :  { %71 = vmatpush.msra.mxu0 %v48_v1 }
  0x10   :  { %72 = vmatpush.msra.mxu0 %v47_v2 }
  0x12   :  { %73 = vmatpush.msra.mxu0 %v46_v3 }
  0x13   :  { %97 = vmatmul.msk.f32.vlgmr.msra.gmra.mxu0 %vm54_vm0, %v45_v4 }
  0x90   :  { %v75_v6 = vpop.f32.mrf.mxu0 }
  0x91   :  { %v76_v7 = vadd.f32 %v103_v5, %v75_v6 }
  0x93   :  { %78 = vst [vmem:[#allocation7] sm:$0xff] %v76_v7 }
  0x94   :  { %89 = dma.vmem_to_hbm [thread:$0]  %s85_s25, 128, %s87_s28, [#allocation4]  }
  0x95   :  { %180 = dma.done.wait [#allocation4], 128  }
  0x96   :  { %181 = vsyncadd [#allocation4], 4294967168 }
  0x97   :  { %94 = vsyncpa [#allocation3], 1 }
  0x98   :  { %95 = vsyncpa [#allocation6], 1 }
  0x99   :  { %96 = vsyncpa [#allocation4], 1 }

</bundles_post_ra>
